<compile_context>
chip_gen: v7x
topology: tpu7x:2x2x1
jax: 0.10.0
libtpu: 0.0.40
codegen_flags: <defaults>
</compile_context>

<pallas_src>
import functools

import jax
import jax.numpy as jnp
from jax.experimental import pallas as pl
from jax.experimental.pallas import tpu as pltpu


# ------------------------------ fused kernel ------------------------------- #

def _gcn_fused_kernel(*refs, eps):
    """refs = (x, gamma_in, beta_in, [R_i, gamma_i, beta_i]*n_layers, out).

    x:          (N, B, F)     native module input layout
    R_i:        (N*S, N*H)    kron(L^T, W_i^T)  -- graph prop + linear, fused
    gamma/beta: (1, C)        BatchNorm1d affine params
    out:        (N, B, H)     native module output layout
    """
    x_ref, gin_ref, bin_ref = refs[0], refs[1], refs[2]
    o_ref = refs[-1]
    op_refs = refs[3:-1]
    n_layers = len(op_refs) // 3

    N, B, F = x_ref.shape
    H = o_ref.shape[2]

    def bn(a, gamma, beta, relu):
        # PyTorch BatchNorm1d training-mode forward: per-column batch stats,
        # biased variance, eps; affine folded into one scale/shift VPU pass.
        mean = jnp.mean(a, axis=0, keepdims=True)
        cen = a - mean
        var = jnp.mean(cen * cen, axis=0, keepdims=True)
        scale = gamma * jax.lax.rsqrt(var + eps)        # rsqrt -> EUP slot
        shift = beta - mean * scale
        y = a * scale + shift
        return jnp.maximum(y, 0.0) if relu else y

    # Gather native (N, B, F) -> lane-dense (B, N*F) slab (bn_in layout).
    a = jnp.concatenate([x_ref[n] for n in range(N)], axis=-1)    # (B, N*F)
    a = bn(a, gin_ref[...], bin_ref[...], relu=False)             # bn_in

    # Hidden layers: ONE matmul per layer (R = kron(L^T, W^T)) + fused BN+ReLU.
    for i in range(n_layers):
        r_ref, g_ref, b_ref = op_refs[3 * i: 3 * i + 3]
        a = jnp.dot(a.astype(r_ref.dtype), r_ref[...],
                    preferred_element_type=jnp.float32)           # Linear(L @ h)
        a = bn(a, g_ref[...], b_ref[...], relu=True)

    # Scatter (B, N*H) slab -> native (N, B, H) output.
    for n in range(N):
        o_ref[n] = a[:, n * H:(n + 1) * H].astype(o_ref.dtype)


# ------------------------- operator precomputation -------------------------- #

def build_gcn_operators(L, fc_weights, bn_in_params, bn_params,
                        operator_dtype=jnp.float32):
    """Build per-layer fused operators + (1,C) BN params ONCE per parameter set.

    a @ kron(L^T, W^T)  ==  Linear_{W,no bias}(L @ h) in the (B, N*S) slab
    layout (exact: kron(L^T, I_S) @ kron(I_N, W^T) = kron(L^T, W^T)).
    Call outside the per-step jitted forward so none of this XLA glue runs per call.
    """
    f32 = jnp.float32
    ops = [bn_in_params[0].reshape(1, -1).astype(f32),
           bn_in_params[1].reshape(1, -1).astype(f32)]
    Lt = L.T.astype(f32)
    for W, (g, b) in zip(fc_weights, bn_params):
        R = jnp.kron(Lt, W.T.astype(f32)).astype(operator_dtype)   # (N*S, N*H)
        ops += [R, g.reshape(1, -1).astype(f32), b.reshape(1, -1).astype(f32)]
    return tuple(ops)


# ------------------------------- GCN forward -------------------------------- #

@jax.jit
def gcn_forward(x, operators):
    """x: (nodes_n, batch, features_n); operators from build_gcn_operators.
    Returns h: (nodes_n, batch, hidden_size)."""
    N, B, F = x.shape
    H = operators[2].shape[1] // N        # R_0 is (N*F, N*H)

    kernel = functools.partial(_gcn_fused_kernel, eps=1e-5)
    vmem = pl.BlockSpec(memory_space=pltpu.MemorySpace.VMEM)

    return pl.pallas_call(
        kernel,
        out_shape=jax.ShapeDtypeStruct((N, B, H), jnp.float32),
        in_specs=[vmem] * (1 + len(operators)),
        out_specs=vmem,
    )(x.astype(jnp.float32), *operators)


# ------------------------- pure-JAX reference (check) ----------------------- #

def _gcn_reference(x, L, fc_weights, bn_in_params, bn_params, hidden_size, eps=1e-5):
    N, B, F = x.shape

    def bn(a, g, b):
        m = jnp.mean(a, axis=0, keepdims=True)
        v = jnp.mean((a - m) ** 2, axis=0, keepdims=True)
        return (a - m) / jnp.sqrt(v + eps) * g + b

    h = jnp.transpose(x, (1, 0, 2)).reshape(B, N * F)
    h = bn(h, bn_in_params[0], bn_in_params[1])
    h = jnp.transpose(h.reshape(B, N, F), (1, 0, 2))
    for i, W in enumerate(fc_weights):
        S = h.shape[2]
        h = (L @ h.reshape(N, B * S)).reshape(N * B, S)
        h = h @ W.T
        h = h.reshape(N, B, hidden_size)
        h2 = jnp.transpose(h, (1, 0, 2)).reshape(B, N * hidden_size)
        g, b = bn_params[i]
        h2 = bn(h2, g, b)
        h = jnp.transpose(h2.reshape(B, N, hidden_size), (1, 0, 2))
        h = jnp.maximum(h, 0.0)
    return h


# ---------------------------------- main ------------------------------------ #

if __name__ == "__main__":
    nodes_n = 8
    features_n = 4
    hidden_size = 16
    layers_n = 3            # => 2 hidden layers (fc_0, fc_1)
    batch = 8               # fills all 8 f32 vreg sublanes

    key = jax.random.PRNGKey(0)
    k_x, k_L, k_w0, k_w1 = jax.random.split(key, 4)

    # Input: (nodes_n, batch, features_n), matching the PyTorch forward signature.
    x = jax.random.normal(k_x, (nodes_n, batch, features_n), dtype=jnp.float32)

    # Deterministic symmetric-normalized Laplacian-like matrix.
    A = jax.random.uniform(k_L, (nodes_n, nodes_n), dtype=jnp.float32)
    A = 0.5 * (A + A.T)
    deg = jnp.sum(A, axis=1)
    d_inv_sqrt = 1.0 / jnp.sqrt(deg)
    L = jnp.eye(nodes_n, dtype=jnp.float32) - d_inv_sqrt[:, None] * A * d_inv_sqrt[None, :]

    # Linear weights: init.uniform_ (U[0,1)), PyTorch layout (out, in), bias=False.
    fc_weights = [
        jax.random.uniform(k_w0, (hidden_size, features_n), dtype=jnp.float32),
        jax.random.uniform(k_w1, (hidden_size, hidden_size), dtype=jnp.float32),
    ]

    # BatchNorm1d params at default init: weight=1, bias=0.
    bn_in_params = (jnp.ones((nodes_n * features_n,), jnp.float32),
                    jnp.zeros((nodes_n * features_n,), jnp.float32))
    bn_params = [
        (jnp.ones((nodes_n * hidden_size,), jnp.float32),
         jnp.zeros((nodes_n * hidden_size,), jnp.float32))
        for _ in range(layers_n - 1)
    ]
    # TODO(synk): BatchNorm running_mean/running_var tracking (a training-time side
    # effect) is not reproduced; only the training-mode normalization used in forward().

    # Operator construction hoisted out of the per-step path (built once).
    operators = jax.block_until_ready(
        build_gcn_operators(L, fc_weights, bn_in_params, bn_params))

    out = jax.block_until_ready(gcn_forward(x, operators))

    assert out.shape == (nodes_n, batch, hidden_size), out.shape
    assert bool(jnp.all(jnp.isfinite(out)))

    ref = _gcn_reference(x, L, fc_weights, bn_in_params, bn_params, hidden_size)
    assert bool(jnp.allclose(out, ref, rtol=1e-3, atol=1e-3)), (
        float(jnp.max(jnp.abs(out - ref))))

    print("KERNEL_OK")
</pallas_src>

<mosaic_0001>
module attributes {stable_mosaic.version = 11 : i64} {
  func.func @_gcn_fused_kernel(%arg0: memref<8x8x4xf32, #tpu.memory_space<vmem>>, %arg1: memref<1x32xf32, #tpu.memory_space<vmem>>, %arg2: memref<1x32xf32, #tpu.memory_space<vmem>>, %arg3: memref<32x128xf32, #tpu.memory_space<vmem>>, %arg4: memref<1x128xf32, #tpu.memory_space<vmem>>, %arg5: memref<1x128xf32, #tpu.memory_space<vmem>>, %arg6: memref<128x128xf32, #tpu.memory_space<vmem>>, %arg7: memref<1x128xf32, #tpu.memory_space<vmem>>, %arg8: memref<1x128xf32, #tpu.memory_space<vmem>>, %arg9: memref<8x8x16xf32, #tpu.memory_space<vmem>>) attributes {dimension_semantics = [], scalar_prefetch = 0 : i64, scratch_operands = 0 : i64, tpu.core_type = #tpu.core_type<tc>} {
    %c0 = arith.constant 0 : index
    %c0_0 = arith.constant 0 : index
    %c0_1 = arith.constant 0 : index
    %0 = vector.load %arg0[%c0, %c0_0, %c0_1] : memref<8x8x4xf32, #tpu.memory_space<vmem>>, vector<1x8x4xf32>
    %1 = vector.shape_cast %0 : vector<1x8x4xf32> to vector<8x4xf32>
    %c1 = arith.constant 1 : index
    %c0_2 = arith.constant 0 : index
    %c0_3 = arith.constant 0 : index
    %2 = vector.load %arg0[%c1, %c0_2, %c0_3] : memref<8x8x4xf32, #tpu.memory_space<vmem>>, vector<1x8x4xf32>
    %3 = vector.shape_cast %2 : vector<1x8x4xf32> to vector<8x4xf32>
    %c2 = arith.constant 2 : index
    %c0_4 = arith.constant 0 : index
    %c0_5 = arith.constant 0 : index
    %4 = vector.load %arg0[%c2, %c0_4, %c0_5] : memref<8x8x4xf32, #tpu.memory_space<vmem>>, vector<1x8x4xf32>
    %5 = vector.shape_cast %4 : vector<1x8x4xf32> to vector<8x4xf32>
    %c3 = arith.constant 3 : index
    %c0_6 = arith.constant 0 : index
    %c0_7 = arith.constant 0 : index
    %6 = vector.load %arg0[%c3, %c0_6, %c0_7] : memref<8x8x4xf32, #tpu.memory_space<vmem>>, vector<1x8x4xf32>
    %7 = vector.shape_cast %6 : vector<1x8x4xf32> to vector<8x4xf32>
    %c4 = arith.constant 4 : index
    %c0_8 = arith.constant 0 : index
    %c0_9 = arith.constant 0 : index
    %8 = vector.load %arg0[%c4, %c0_8, %c0_9] : memref<8x8x4xf32, #tpu.memory_space<vmem>>, vector<1x8x4xf32>
    %9 = vector.shape_cast %8 : vector<1x8x4xf32> to vector<8x4xf32>
    %c5 = arith.constant 5 : index
    %c0_10 = arith.constant 0 : index
    %c0_11 = arith.constant 0 : index
    %10 = vector.load %arg0[%c5, %c0_10, %c0_11] : memref<8x8x4xf32, #tpu.memory_space<vmem>>, vector<1x8x4xf32>
    %11 = vector.shape_cast %10 : vector<1x8x4xf32> to vector<8x4xf32>
    %c6 = arith.constant 6 : index
    %c0_12 = arith.constant 0 : index
    %c0_13 = arith.constant 0 : index
    %12 = vector.load %arg0[%c6, %c0_12, %c0_13] : memref<8x8x4xf32, #tpu.memory_space<vmem>>, vector<1x8x4xf32>
    %13 = vector.shape_cast %12 : vector<1x8x4xf32> to vector<8x4xf32>
    %c7 = arith.constant 7 : index
    %c0_14 = arith.constant 0 : index
    %c0_15 = arith.constant 0 : index
    %14 = vector.load %arg0[%c7, %c0_14, %c0_15] : memref<8x8x4xf32, #tpu.memory_space<vmem>>, vector<1x8x4xf32>
    %15 = vector.shape_cast %14 : vector<1x8x4xf32> to vector<8x4xf32>
    %16 = tpu.concatenate %1, %3, %5, %7, %9, %11, %13, %15 in 1 : vector<8x4xf32>, vector<8x4xf32>, vector<8x4xf32>, vector<8x4xf32>, vector<8x4xf32>, vector<8x4xf32>, vector<8x4xf32>, vector<8x4xf32> -> vector<8x32xf32>
    %c0_16 = arith.constant 0 : index
    %c0_17 = arith.constant 0 : index
    %17 = vector.load %arg1[%c0_16, %c0_17] : memref<1x32xf32, #tpu.memory_space<vmem>>, vector<1x32xf32>
    %c0_18 = arith.constant 0 : index
    %c0_19 = arith.constant 0 : index
    %18 = vector.load %arg2[%c0_18, %c0_19] : memref<1x32xf32, #tpu.memory_space<vmem>>, vector<1x32xf32>
    %cst = arith.constant dense<0.000000e+00> : vector<32xf32>
    %19 = vector.multi_reduction <add>, %16, %cst [0] : vector<8x32xf32> to vector<32xf32>
    %20 = vector.shape_cast %19 : vector<32xf32> to vector<1x32xf32>
    %cst_20 = arith.constant 8.000000e+00 : f32
    %21 = vector.broadcast %cst_20 : f32 to vector<1x32xf32>
    %22 = arith.divf %20, %21 : vector<1x32xf32>
    %23 = vector.broadcast %22 : vector<1x32xf32> to vector<8x32xf32>
    %24 = arith.subf %16, %23 : vector<8x32xf32>
    %25 = arith.mulf %24, %24 : vector<8x32xf32>
    %cst_21 = arith.constant dense<0.000000e+00> : vector<32xf32>
    %26 = vector.multi_reduction <add>, %25, %cst_21 [0] : vector<8x32xf32> to vector<32xf32>
    %27 = vector.shape_cast %26 : vector<32xf32> to vector<1x32xf32>
    %cst_22 = arith.constant 8.000000e+00 : f32
    %28 = vector.broadcast %cst_22 : f32 to vector<1x32xf32>
    %29 = arith.divf %27, %28 : vector<1x32xf32>
    %cst_23 = arith.constant 9.99999974E-6 : f32
    %30 = vector.broadcast %cst_23 : f32 to vector<1x32xf32>
    %31 = arith.addf %29, %30 : vector<1x32xf32>
    %32 = math.rsqrt %31 : vector<1x32xf32>
    %33 = arith.mulf %17, %32 : vector<1x32xf32>
    %34 = arith.mulf %22, %33 : vector<1x32xf32>
    %35 = arith.subf %18, %34 : vector<1x32xf32>
    %36 = vector.broadcast %33 : vector<1x32xf32> to vector<8x32xf32>
    %37 = arith.mulf %16, %36 : vector<8x32xf32>
    %38 = vector.broadcast %35 : vector<1x32xf32> to vector<8x32xf32>
    %39 = arith.addf %37, %38 : vector<8x32xf32>
    %c0_24 = arith.constant 0 : index
    %c0_25 = arith.constant 0 : index
    %40 = vector.load %arg3[%c0_24, %c0_25] : memref<32x128xf32, #tpu.memory_space<vmem>>, vector<32x128xf32>
    %cst_26 = arith.constant dense<0.000000e+00> : vector<8x128xf32>
    %41 = tpu.matmul %39, %40, %cst_26 {dimension_numbers = #tpu.dot_dimension_numbers<[1], [0], [0], [1], [0, 0, 1, 1], [], []>} : vector<8x32xf32>, vector<32x128xf32>, vector<8x128xf32> -> vector<8x128xf32>
    %c0_27 = arith.constant 0 : index
    %c0_28 = arith.constant 0 : index
    %42 = vector.load %arg4[%c0_27, %c0_28] : memref<1x128xf32, #tpu.memory_space<vmem>>, vector<1x128xf32>
    %c0_29 = arith.constant 0 : index
    %c0_30 = arith.constant 0 : index
    %43 = vector.load %arg5[%c0_29, %c0_30] : memref<1x128xf32, #tpu.memory_space<vmem>>, vector<1x128xf32>
    %cst_31 = arith.constant dense<0.000000e+00> : vector<128xf32>
    %44 = vector.multi_reduction <add>, %41, %cst_31 [0] : vector<8x128xf32> to vector<128xf32>
    %45 = vector.shape_cast %44 : vector<128xf32> to vector<1x128xf32>
    %cst_32 = arith.constant 8.000000e+00 : f32
    %46 = vector.broadcast %cst_32 : f32 to vector<1x128xf32>
    %47 = arith.divf %45, %46 : vector<1x128xf32>
    %48 = vector.broadcast %47 : vector<1x128xf32> to vector<8x128xf32>
    %49 = arith.subf %41, %48 : vector<8x128xf32>
    %50 = arith.mulf %49, %49 : vector<8x128xf32>
    %cst_33 = arith.constant dense<0.000000e+00> : vector<128xf32>
    %51 = vector.multi_reduction <add>, %50, %cst_33 [0] : vector<8x128xf32> to vector<128xf32>
    %52 = vector.shape_cast %51 : vector<128xf32> to vector<1x128xf32>
    %cst_34 = arith.constant 8.000000e+00 : f32
    %53 = vector.broadcast %cst_34 : f32 to vector<1x128xf32>
    %54 = arith.divf %52, %53 : vector<1x128xf32>
    %cst_35 = arith.constant 9.99999974E-6 : f32
    %55 = vector.broadcast %cst_35 : f32 to vector<1x128xf32>
    %56 = arith.addf %54, %55 : vector<1x128xf32>
    %57 = math.rsqrt %56 : vector<1x128xf32>
    %58 = arith.mulf %42, %57 : vector<1x128xf32>
    %59 = arith.mulf %47, %58 : vector<1x128xf32>
    %60 = arith.subf %43, %59 : vector<1x128xf32>
    %61 = vector.broadcast %58 : vector<1x128xf32> to vector<8x128xf32>
    %62 = arith.mulf %41, %61 : vector<8x128xf32>
    %63 = vector.broadcast %60 : vector<1x128xf32> to vector<8x128xf32>
    %64 = arith.addf %62, %63 : vector<8x128xf32>
    %cst_36 = arith.constant 0.000000e+00 : f32
    %65 = vector.broadcast %cst_36 : f32 to vector<8x128xf32>
    %66 = arith.maximumf %64, %65 : vector<8x128xf32>
    %c0_37 = arith.constant 0 : index
    %c0_38 = arith.constant 0 : index
    %67 = vector.load %arg6[%c0_37, %c0_38] : memref<128x128xf32, #tpu.memory_space<vmem>>, vector<128x128xf32>
    %cst_39 = arith.constant dense<0.000000e+00> : vector<8x128xf32>
    %68 = tpu.matmul %66, %67, %cst_39 {dimension_numbers = #tpu.dot_dimension_numbers<[1], [0], [0], [1], [0, 0, 1, 1], [], []>} : vector<8x128xf32>, vector<128x128xf32>, vector<8x128xf32> -> vector<8x128xf32>
    %c0_40 = arith.constant 0 : index
    %c0_41 = arith.constant 0 : index
    %69 = vector.load %arg7[%c0_40, %c0_41] : memref<1x128xf32, #tpu.memory_space<vmem>>, vector<1x128xf32>
    %c0_42 = arith.constant 0 : index
    %c0_43 = arith.constant 0 : index
    %70 = vector.load %arg8[%c0_42, %c0_43] : memref<1x128xf32, #tpu.memory_space<vmem>>, vector<1x128xf32>
    %cst_44 = arith.constant dense<0.000000e+00> : vector<128xf32>
    %71 = vector.multi_reduction <add>, %68, %cst_44 [0] : vector<8x128xf32> to vector<128xf32>
    %72 = vector.shape_cast %71 : vector<128xf32> to vector<1x128xf32>
    %cst_45 = arith.constant 8.000000e+00 : f32
    %73 = vector.broadcast %cst_45 : f32 to vector<1x128xf32>
    %74 = arith.divf %72, %73 : vector<1x128xf32>
    %75 = vector.broadcast %74 : vector<1x128xf32> to vector<8x128xf32>
    %76 = arith.subf %68, %75 : vector<8x128xf32>
    %77 = arith.mulf %76, %76 : vector<8x128xf32>
    %cst_46 = arith.constant dense<0.000000e+00> : vector<128xf32>
    %78 = vector.multi_reduction <add>, %77, %cst_46 [0] : vector<8x128xf32> to vector<128xf32>
    %79 = vector.shape_cast %78 : vector<128xf32> to vector<1x128xf32>
    %cst_47 = arith.constant 8.000000e+00 : f32
    %80 = vector.broadcast %cst_47 : f32 to vector<1x128xf32>
    %81 = arith.divf %79, %80 : vector<1x128xf32>
    %cst_48 = arith.constant 9.99999974E-6 : f32
    %82 = vector.broadcast %cst_48 : f32 to vector<1x128xf32>
    %83 = arith.addf %81, %82 : vector<1x128xf32>
    %84 = math.rsqrt %83 : vector<1x128xf32>
    %85 = arith.mulf %69, %84 : vector<1x128xf32>
    %86 = arith.mulf %74, %85 : vector<1x128xf32>
    %87 = arith.subf %70, %86 : vector<1x128xf32>
    %88 = vector.broadcast %85 : vector<1x128xf32> to vector<8x128xf32>
    %89 = arith.mulf %68, %88 : vector<8x128xf32>
    %90 = vector.broadcast %87 : vector<1x128xf32> to vector<8x128xf32>
    %91 = arith.addf %89, %90 : vector<8x128xf32>
    %cst_49 = arith.constant 0.000000e+00 : f32
    %92 = vector.broadcast %cst_49 : f32 to vector<8x128xf32>
    %93 = arith.maximumf %91, %92 : vector<8x128xf32>
    %94 = vector.extract_strided_slice %93 {offsets = [0, 0], sizes = [8, 16], strides = [1, 1]} : vector<8x128xf32> to vector<8x16xf32>
    %c0_50 = arith.constant 0 : index
    %c0_51 = arith.constant 0 : index
    %c0_52 = arith.constant 0 : index
    %95 = vector.load %arg9[%c0_50, %c0_51, %c0_52] : memref<8x8x16xf32, #tpu.memory_space<vmem>>, vector<1x8x16xf32>
    %96 = vector.shape_cast %95 : vector<1x8x16xf32> to vector<8x16xf32>
    %97 = vector.shape_cast %94 : vector<8x16xf32> to vector<1x8x16xf32>
    tpu.vector_store %arg9[%c0_50, %c0_51, %c0_52], %97 {strides = array<i32>} : memref<8x8x16xf32, #tpu.memory_space<vmem>>, vector<1x8x16xf32>,
    %98 = vector.extract_strided_slice %93 {offsets = [0, 16], sizes = [8, 16], strides = [1, 1]} : vector<8x128xf32> to vector<8x16xf32>
    %c1_53 = arith.constant 1 : index
    %c0_54 = arith.constant 0 : index
    %c0_55 = arith.constant 0 : index
    %99 = vector.load %arg9[%c1_53, %c0_54, %c0_55] : memref<8x8x16xf32, #tpu.memory_space<vmem>>, vector<1x8x16xf32>
    %100 = vector.shape_cast %99 : vector<1x8x16xf32> to vector<8x16xf32>
    %101 = vector.shape_cast %98 : vector<8x16xf32> to vector<1x8x16xf32>
    tpu.vector_store %arg9[%c1_53, %c0_54, %c0_55], %101 {strides = array<i32>} : memref<8x8x16xf32, #tpu.memory_space<vmem>>, vector<1x8x16xf32>,
    %102 = vector.extract_strided_slice %93 {offsets = [0, 32], sizes = [8, 16], strides = [1, 1]} : vector<8x128xf32> to vector<8x16xf32>
    %c2_56 = arith.constant 2 : index
    %c0_57 = arith.constant 0 : index
    %c0_58 = arith.constant 0 : index
    %103 = vector.load %arg9[%c2_56, %c0_57, %c0_58] : memref<8x8x16xf32, #tpu.memory_space<vmem>>, vector<1x8x16xf32>
    %104 = vector.shape_cast %103 : vector<1x8x16xf32> to vector<8x16xf32>
    %105 = vector.shape_cast %102 : vector<8x16xf32> to vector<1x8x16xf32>
    tpu.vector_store %arg9[%c2_56, %c0_57, %c0_58], %105 {strides = array<i32>} : memref<8x8x16xf32, #tpu.memory_space<vmem>>, vector<1x8x16xf32>,
    %106 = vector.extract_strided_slice %93 {offsets = [0, 48], sizes = [8, 16], strides = [1, 1]} : vector<8x128xf32> to vector<8x16xf32>
    %c3_59 = arith.constant 3 : index
    %c0_60 = arith.constant 0 : index
    %c0_61 = arith.constant 0 : index
    %107 = vector.load %arg9[%c3_59, %c0_60, %c0_61] : memref<8x8x16xf32, #tpu.memory_space<vmem>>, vector<1x8x16xf32>
    %108 = vector.shape_cast %107 : vector<1x8x16xf32> to vector<8x16xf32>
    %109 = vector.shape_cast %106 : vector<8x16xf32> to vector<1x8x16xf32>
    tpu.vector_store %arg9[%c3_59, %c0_60, %c0_61], %109 {strides = array<i32>} : memref<8x8x16xf32, #tpu.memory_space<vmem>>, vector<1x8x16xf32>,
    %110 = vector.extract_strided_slice %93 {offsets = [0, 64], sizes = [8, 16], strides = [1, 1]} : vector<8x128xf32> to vector<8x16xf32>
    %c4_62 = arith.constant 4 : index
    %c0_63 = arith.constant 0 : index
    %c0_64 = arith.constant 0 : index
    %111 = vector.load %arg9[%c4_62, %c0_63, %c0_64] : memref<8x8x16xf32, #tpu.memory_space<vmem>>, vector<1x8x16xf32>
    %112 = vector.shape_cast %111 : vector<1x8x16xf32> to vector<8x16xf32>
    %113 = vector.shape_cast %110 : vector<8x16xf32> to vector<1x8x16xf32>
    tpu.vector_store %arg9[%c4_62, %c0_63, %c0_64], %113 {strides = array<i32>} : memref<8x8x16xf32, #tpu.memory_space<vmem>>, vector<1x8x16xf32>,
    %114 = vector.extract_strided_slice %93 {offsets = [0, 80], sizes = [8, 16], strides = [1, 1]} : vector<8x128xf32> to vector<8x16xf32>
    %c5_65 = arith.constant 5 : index
    %c0_66 = arith.constant 0 : index
    %c0_67 = arith.constant 0 : index
    %115 = vector.load %arg9[%c5_65, %c0_66, %c0_67] : memref<8x8x16xf32, #tpu.memory_space<vmem>>, vector<1x8x16xf32>
    %116 = vector.shape_cast %115 : vector<1x8x16xf32> to vector<8x16xf32>
    %117 = vector.shape_cast %114 : vector<8x16xf32> to vector<1x8x16xf32>
    tpu.vector_store %arg9[%c5_65, %c0_66, %c0_67], %117 {strides = array<i32>} : memref<8x8x16xf32, #tpu.memory_space<vmem>>, vector<1x8x16xf32>,
    %118 = vector.extract_strided_slice %93 {offsets = [0, 96], sizes = [8, 16], strides = [1, 1]} : vector<8x128xf32> to vector<8x16xf32>
    %c6_68 = arith.constant 6 : index
    %c0_69 = arith.constant 0 : index
    %c0_70 = arith.constant 0 : index
    %119 = vector.load %arg9[%c6_68, %c0_69, %c0_70] : memref<8x8x16xf32, #tpu.memory_space<vmem>>, vector<1x8x16xf32>
    %120 = vector.shape_cast %119 : vector<1x8x16xf32> to vector<8x16xf32>
    %121 = vector.shape_cast %118 : vector<8x16xf32> to vector<1x8x16xf32>
    tpu.vector_store %arg9[%c6_68, %c0_69, %c0_70], %121 {strides = array<i32>} : memref<8x8x16xf32, #tpu.memory_space<vmem>>, vector<1x8x16xf32>,
    %122 = vector.extract_strided_slice %93 {offsets = [0, 112], sizes = [8, 16], strides = [1, 1]} : vector<8x128xf32> to vector<8x16xf32>
    %c7_71 = arith.constant 7 : index
    %c0_72 = arith.constant 0 : index
    %c0_73 = arith.constant 0 : index
    %123 = vector.load %arg9[%c7_71, %c0_72, %c0_73] : memref<8x8x16xf32, #tpu.memory_space<vmem>>, vector<1x8x16xf32>
    %124 = vector.shape_cast %123 : vector<1x8x16xf32> to vector<8x16xf32>
    %125 = vector.shape_cast %122 : vector<8x16xf32> to vector<1x8x16xf32>
    tpu.vector_store %arg9[%c7_71, %c0_72, %c0_73], %125 {strides = array<i32>} : memref<8x8x16xf32, #tpu.memory_space<vmem>>, vector<1x8x16xf32>,
    return
  }
}

</mosaic_0001>

<bundles_post_ra>
// kernel: gcn_forward.1
= control target key start
LH: loop header
LB: loop body
LE: loop exit
PB: predicated region body
PF: predicated region fallthrough
CT: control target
= control target key end

     0   :  { %14 = vsyncpa [#allocation3], 0  ;;  %s803_s0 = inlined_call_operand.vmem [shape: f32[8,8,4], index: 0, kind: input, shape index: {}]   ;;  %s804_s1 = inlined_call_operand.vmem [shape: f32[1,32], index: 1, kind: input, shape index: {}]   ;;  %s805_s2 = inlined_call_operand.vmem [shape: f32[1,32], index: 2, kind: input, shape index: {}]   ;;  %s806_s3 = inlined_call_operand.vmem [shape: f32[32,128], index: 3, kind: input, shape index: {}]   ;;  %s807_s4 = inlined_call_operand.vmem [shape: f32[1,128], index: 4, kind: input, shape index: {}]   ;;  %s808_s5 = inlined_call_operand.vmem [shape: f32[1,128], index: 5, kind: input, shape index: {}]   ;;  %s809_s6 = inlined_call_operand.hbm [shape: f32[128,128], index: 6, kind: input, shape index: {}]   ;;  %s810_s7 = inlined_call_operand.vmem [shape: f32[1,128], index: 7, kind: input, shape index: {}]   ;;  %s811_s8 = inlined_call_operand.vmem [shape: f32[1,128], index: 8, kind: input, shape index: {}]   ;;  %s812_s9 = inlined_call_operand.hbm [shape: f32[8,8,16], index: 9, kind: output, shape index: {}]  }
   0x1   :  { %15 = vsyncpa [#allocation4], 0  ;;  %s617_s30 = smov [#allocation2]   ;;  %s569_s13 = scalar_lea.hbm %s809_s6, 2048 }
   0x2   :  { %s33_s10 = sshll.u32 %s617_s30, 4  ;;  %p570_p0 = scmp.ne.s32.totalorder %s809_s6, %s569_s13  ;;  %s34_s10 = int_to_ptr.vmem [resolvable:$true] %s33_s10 }
   0x3   :  { %p573_p1 = scmp.lt.u32.totalorder %s569_s13, %s809_s6 }
   0x5   :  { %p575_p2 = pnand %p573_p1, %p570_p0 }
   0x7   :  { %578 = shalt.err (!%p575_p2)
}
   0x8   :  { %s579_s18 = scalar_lea.vmem %s34_s10, 2048  ;;  %p584_p4 = scmp.lt.s32.totalorder %s34_s10, %s34_s10 }
   0x9   :  { %p580_p3 = scmp.ne.s32.totalorder %s34_s10, %s579_s18  ;;  %p585_p5 = scmp.lt.s32.totalorder %s579_s18, %s579_s18 }
   0xb   :  { %p586_p6 = por %p585_p5, %p584_p4 }
   0xd   :  { %p587_p7 = pnand %p586_p6, %p580_p3 }
   0xf   :  { %590 = shalt.err (!%p587_p7)
}
  0x10   :  { %s618_s19 = smov 128   ;;  %s619_s20 = smov 8  }
  0x11   :  { %39 = dma.hbm_to_vmem [thread:$0]  %s809_s6, 2048, %s34_s10, [#allocation3], %s618_s19, %s618_s19, %s619_s20  }
  0x12   :  { %613 = dma.done.wait [#allocation3], 2048  }
  0x13   :  { %614 = vsyncadd [#allocation3], 4294965248  ;;  %v438_v0 = vld [vmem:[%s803_s0 + $0x8] sm:$0xff]  ;;  %v440_v1 = vld [vmem:[%s803_s0 + $0x18] sm:$0xff]  ;;  %s620_s27 = smov 4   ;;  %s621_s28 = smov 12   ;;  %v132_v49 = vlaneseq }
  0x14   :  { %63 = vrot.lane.b32.xlu0 %v438_v0, %s620_s27  ;;  %71 = vrot.lane.b32.xlu1 %v440_v1, %s621_s28  ;;  %v439_v2 = vld [vmem:[%s803_s0 + $0x10] sm:$0xff]  ;;  %v441_v3 = vld [vmem:[%s803_s0 + $0x20] sm:$0xff]  ;;  %v622_v4 = vmov 0.0|0.0   ;;  %vm623_vm0 = vmmov 0   ;;  %v624_v5 = vmov 0.0   ;;  %s625_s21 = smov 16  }
  0x15   :  { %514 = vmatprep.subr.bf16.mxu0 %v622_v4  ;;  %476 = vmatprep.mubr.msk.f32.mxu0 %vm623_vm0, %v624_v5  ;;  %v145_v6 = vld [vmem:[%s806_s3] sm:$0xff]  ;;  %v146_v7 = vld [vmem:[%s806_s3 + $0x8] sm:$0xff]  ;;  %v147_v8 = vld [vmem:[%s806_s3 + $0x10] sm:$0xff]  ;;  %s626_s26 = smov 20   ;;  %s628_s29 = smov 28   ;;  %vm90_vm1 = vcmask 31744  }
  0x16   :  { %520 = vmatprep.subr.bf16.mxu1 %v622_v4  ;;  %511 = vmatprep.mubr.msk.f32.mxu1 %vm623_vm0, %v624_v5  ;;  %v515_v9 = vpack.c.bf16 %v146_v7, %v145_v6  ;;  %v148_v10 = vld [vmem:[%s806_s3 + $0x18] sm:$0xff]  ;;  %v442_v11 = vld [vmem:[%s803_s0 + $0x28] sm:$0xff]  ;;  %v443_v12 = vld [vmem:[%s803_s0 + $0x30] sm:$0xff]  ;;  %s627_s3 = smov 24   ;;  %vm92_vm2 = vcmask 64512   ;;  %vm94_vm3 = vcmask 97280  }
  0x17   :  { %v518_v13 = vpack.c.bf16 %v148_v10, %v147_v8  ;;  %v444_v14 = vld [vmem:[%s803_s0 + $0x38] sm:$0xff]  ;;  %v47_v17 = vld [vmem:[%s803_s0] sm:$0xff]  ;;  %vm96_vm4 = vcmask 130048   ;;  %vm98_vm5 = vcmask 162816   ;;  %vm100_vm6 = vcmask 195584   ;;  %v261_v63 = vld [vmem:[#allocation2 + $0x8] sm:$0xff] }
  0x18   :  { %67 = vrot.lane.b32.xlu0 %v439_v2, %s619_s20  ;;  %75 = vrot.lane.b32.xlu1 %v441_v3, %s625_s21  ;;  %vm102_vm7 = vcmask 228352   ;;  %vm106_vm8 = vcmask 261120   ;;  %v133_v50 = vshrl.u32 %v132_v49, 7  ;;  %v104_v51 = vld [vmem:[%s804_s1] sm:$0x1]  ;;  %v262_v1 = vld [vmem:[#allocation2 + $0x10] sm:$0xff] }
  0x19   :  { %516 = vmatpush3.bf16.msra.mxu0 %v515_v9  ;;  %v105_v55 = vld [vmem:[%s805_s2] sm:$0x1]  ;;  %v263_v2 = vld [vmem:[#allocation2 + $0x18] sm:$0xff]  ;;  %v265_v6 = vld [vmem:[#allocation2 + $0x28] sm:$0xff]  ;;  %s629_s17 = smov 96   ;;  %s631_s18 = smov 64  }
  0x1a   :  { %517 = vmatprep.subr.bf16.mxu0 %v622_v4  ;;  %v748_v52 = vsub.s32 0, %v133_v50  ;;  %v260_v62 = vld [vmem:[#allocation2] sm:$0xff]  ;;  %v524_v3 = vpack.c.bf16 %v263_v2, %v262_v1  ;;  %v266_v8 = vld [vmem:[#allocation2 + $0x30] sm:$0xff]  ;;  %v267_v9 = vld [vmem:[#allocation2 + $0x38] sm:$0xff]  ;;  %s632_s22 = smov 80   ;;  %s634_s23 = smov 48  }
  0x1b   :  { %v521_v0 = vpack.c.bf16 %v261_v63, %v260_v62  ;;  %v264_v5 = vld [vmem:[#allocation2 + $0x20] sm:$0xff]  ;;  %v530_v10 = vpack.c.bf16 %v267_v9, %v266_v8  ;;  %s635_s24 = smov [#allocation5]  }
  0x1c   :  { %79 = vrot.lane.b32.xlu0 %v442_v11, %s626_s26  ;;  %83 = vrot.lane.b32.xlu1 %v443_v12, %s627_s3  ;;  %v527_v7 = vpack.c.bf16 %v265_v6, %v264_v5  ;;  %v268_v11 = vld [vmem:[#allocation2 + $0x40] sm:$0xff]  ;;  %v269_v12 = vld [vmem:[#allocation2 + $0x48] sm:$0xff]  ;;  %s426_s25 = sshll.u32 %s635_s24, 4  ;;  %s427_s25 = int_to_ptr.vmem [resolvable:$true] %s426_s25 }
  0x1d   :  { %519 = vmatpush3.bf16.msra.mxu0 %v518_v13  ;;  %522 = vmatpush3.bf16.msra.mxu1 %v521_v0  ;;  %v533_v13 = vpack.c.bf16 %v269_v12, %v268_v11  ;;  %v346_v9 = vld [vmem:[%s810_s7] sm:$0x1]  ;;  %s630_s7 = smov 112   ;;  %p596_p9 = scmp.lt.s32.totalorder %s427_s25, %s427_s25 }
  0x1e   :  { %523 = vmatprep.subr.bf16.mxu1 %v622_v4  ;;  %v347_v12 = vld [vmem:[%s811_s8] sm:$0x1]  ;;  %s633_s8 = smov 32  }
  0x20   :  { %87 = vrot.lane.b32.xlu0 %v444_v14, %s628_s29  ;;  %v270_v14 = vld [vmem:[#allocation2 + $0x50] sm:$0xff] }
  0x21   :  { %525 = vmatpush3.bf16.msra.mxu1 %v524_v3 }
  0x22   :  { %526 = vmatprep.subr.bf16.mxu1 %v622_v4 }
  0x25   :  { %528 = vmatpush3.bf16.msra.mxu1 %v527_v7 }
  0x26   :  { %529 = vmatprep.subr.bf16.mxu1 %v622_v4 }
  0x29   :  { %531 = vmatpush3.bf16.msra.mxu1 %v530_v10 }
  0x2a   :  { %532 = vmatprep.subr.bf16.mxu1 %v622_v4 }
  0x2d   :  { %534 = vmatpush3.bf16.msra.mxu1 %v533_v13 }
  0x2e   :  { %535 = vmatprep.subr.bf16.mxu1 %v622_v4 }
  0x86   :  { %v64_v15 = vpop.permute.xlu0 %63  ;;  %v72_v16 = vpop.permute.xlu1 %71 }
  0x87   :  { %v91_v18 = vsel %vm90_vm1, %v47_v17, %v64_v15  ;;  %v271_v15 = vld [vmem:[#allocation2 + $0x58] sm:$0xff]  ;;  %v272_v17 = vld [vmem:[#allocation2 + $0x60] sm:$0xff] }
  0x8a   :  { %v68_v19 = vpop.permute.xlu0 %67  ;;  %v76_v20 = vpop.permute.xlu1 %75 }
  0x8b   :  { %v93_v21 = vsel %vm92_vm2, %v91_v18, %v68_v19  ;;  %v273_v18 = vld [vmem:[#allocation2 + $0x68] sm:$0xff] }
  0x8c   :  { %v95_v22 = vsel %vm94_vm3, %v93_v21, %v72_v16  ;;  %v536_v16 = vpack.c.bf16 %v271_v15, %v270_v14  ;;  %v539_v19 = vpack.c.bf16 %v273_v18, %v272_v17  ;;  %v275_v21 = vld [vmem:[#allocation2 + $0x78] sm:$0xff] }
  0x8d   :  { %v97_v23 = vsel %vm96_vm4, %v95_v22, %v76_v20  ;;  %v274_v20 = vld [vmem:[#allocation2 + $0x70] sm:$0xff] }
  0x8e   :  { %v80_v24 = vpop.permute.xlu0 %79  ;;  %v84_v26 = vpop.permute.xlu1 %83  ;;  %537 = vmatpush3.bf16.msra.mxu1 %v536_v16  ;;  %v542_v22 = vpack.c.bf16 %v275_v21, %v274_v20 }
  0x8f   :  { %v99_v25 = vsel %vm98_vm5, %v97_v23, %v80_v24  ;;  %538 = vmatprep.subr.bf16.mxu1 %v622_v4 }
  0x90   :  { %v101_v27 = vsel %vm100_vm6, %v99_v25, %v84_v26 }
  0x92   :  { %v88_v28 = vpop.permute.xlu0 %87  ;;  %540 = vmatpush3.bf16.msra.mxu1 %v539_v19 }
  0x93   :  { %v103_v29 = vsel %vm102_vm7, %v101_v27, %v88_v28  ;;  %541 = vmatprep.subr.bf16.mxu1 %v622_v4 }
  0x94   :  { %v107_v30 = vsel %vm106_vm8, %v103_v29, 0.0 }
  0x95   :  { %v108_v31 = vrot.slane %v107_v30, 4 }
  0x96   :  { %543 = vmatpush3.bf16.msra.mxu1 %v542_v22 }
  0x97   :  { %v109_v32 = vadd.f32 %v108_v31, %v107_v30 }
  0x99   :  { %v110_v33 = vrot.slane %v109_v32, 2 }
  0x9b   :  { %v111_v34 = vadd.f32 %v110_v33, %v109_v32 }
  0x9d   :  { %v112_v35 = vrot.slane %v111_v34, 1 }
  0x9f   :  { %v113_v36 = vadd.f32 %v112_v35, %v111_v34 }
  0xa1   :  { %v115_v37 = vmul.f32 0.125, %v113_v36 }
  0xa3   :  { %v116_v38 = vsub.f32 %v103_v29, %v115_v37 }
  0xa5   :  { %v117_v39 = vmul.f32 %v116_v38, %v116_v38 }
  0xa7   :  { %v118_v40 = vsel %vm106_vm8, %v117_v39, 0.0 }
  0xa8   :  { %v119_v41 = vrot.slane %v118_v40, 4 }
  0xaa   :  { %v120_v42 = vadd.f32 %v119_v41, %v118_v40  ;;  %v222_v41 = vld [vmem:[%s807_s4] sm:$0x1] }
  0xac   :  { %v121_v43 = vrot.slane %v120_v42, 2 }
  0xae   :  { %v122_v44 = vadd.f32 %v121_v43, %v120_v42 }
  0xb0   :  { %v123_v45 = vrot.slane %v122_v44, 1 }
  0xb2   :  { %v124_v46 = vadd.f32 %v123_v45, %v122_v44  ;;  %v223_v44 = vld [vmem:[%s808_s5] sm:$0x1] }
  0xb4   :  { %v125_v47 = vmul.f32 0.125, %v124_v46 }
  0xb6   :  { %v126_v48 = vadd.f32 1e-05, %v125_v47 }
  0xb8   :  { %563 = vrsqrt.f32 %v126_v48 }
  0xc2   :  { %v564_v53 = vpop.eup %563 }
  0xc3   :  { %v128_v54 = vmul.f32 %v564_v53, %v104_v51 }
  0xc5   :  { %v129_v56 = vmul.f32 %v128_v54, %v115_v37  ;;  %v135_v57 = vrot.slane %v128_v54, %v748_v52 }
  0xc7   :  { %v130_v58 = vsub.f32 %v105_v55, %v129_v56  ;;  %v137_v59 = vmul.f32 %v135_v57, %v103_v29 }
  0xc9   :  { %v142_v60 = vrot.slane %v130_v58, %v748_v52 }
  0xcb   :  { %v144_v61 = vadd.f32 %v142_v60, %v137_v59 }
  0xcd   :  { %477 = vmatmul.mubr.msk.f32.vlgmr.msra.gmra.mrb[0].mxu0 %vm106_vm8, %v144_v61 }
 0x1a0   :  { %v218_v23 = vpop.f32.mrb[0].mxu0 }
 0x1a1   :  { %v224_v24 = vrot.slane %v218_v23, 4  ;;  %v478_v25 = vpop.f32.mrb[1].mxu0 }
 0x1a3   :  { %v225_v26 = vadd.f32 %v224_v24, %v218_v23 }
 0x1a5   :  { %v226_v27 = vrot.slane %v225_v26, 2 }
 0x1a7   :  { %v227_v28 = vadd.f32 %v226_v27, %v225_v26 }
 0x1a9   :  { %v228_v29 = vrot.slane %v227_v28, 1 }
 0x1ab   :  { %v229_v30 = vadd.f32 %v228_v29, %v227_v28 }
 0x1ad   :  { %v230_v31 = vmul.f32 0.125, %v229_v30 }
 0x1af   :  { %v231_v32 = vsub.f32 %v218_v23, %v230_v31 }
 0x1b1   :  { %v232_v33 = vmul.f32 %v231_v32, %v231_v32 }
 0x1b3   :  { %v233_v34 = vrot.slane %v232_v33, 4 }
 0x1b5   :  { %v234_v35 = vadd.f32 %v233_v34, %v232_v33 }
 0x1b7   :  { %v235_v36 = vrot.slane %v234_v35, 2 }
 0x1b9   :  { %v236_v37 = vadd.f32 %v235_v36, %v234_v35 }
 0x1bb   :  { %v237_v38 = vrot.slane %v236_v37, 1 }
 0x1bd   :  { %v238_v39 = vadd.f32 %v237_v38, %v236_v37 }
 0x1bf   :  { %v239_v40 = vmul.f32 0.125, %v238_v39 }
 0x1c1   :  { %v240_v4 = vadd.f32 1e-05, %v239_v40 }
 0x1c3   :  { %565 = vrsqrt.f32 %v240_v4 }
 0x1cd   :  { %v566_v42 = vpop.eup %565 }
 0x1ce   :  { %v242_v43 = vmul.f32 %v566_v42, %v222_v41 }
 0x1d0   :  { %v243_v45 = vmul.f32 %v242_v43, %v230_v31  ;;  %v249_v46 = vrot.slane %v242_v43, %v748_v52 }
 0x1d2   :  { %v244_v47 = vsub.f32 %v223_v44, %v243_v45  ;;  %v251_v48 = vmul.f32 %v249_v46, %v218_v23 }
 0x1d4   :  { %v256_v49 = vrot.slane %v244_v47, %v748_v52 }
 0x1d6   :  { %v258_v50 = vadd.f32 %v256_v49, %v251_v48 }
 0x1d8   :  { %v259_v51 = vmax.f32 %v258_v50, 0.0 }
 0x1da   :  { %512 = vmatmul.mubr.f32.vlgmr.msra.gmra.mrb[0].mxu1 %v259_v51 }
 0x2ad   :  { %v342_v53 = vpop.f32.mrb[0].mxu1 }
 0x2ae   :  { %v348_v54 = vrot.slane %v342_v53, 4  ;;  %v513_v55 = vpop.f32.mrb[1].mxu1 }
 0x2b0   :  { %v349_v56 = vadd.f32 %v348_v54, %v342_v53 }
 0x2b2   :  { %v350_v57 = vrot.slane %v349_v56, 2 }
 0x2b4   :  { %v351_v58 = vadd.f32 %v350_v57, %v349_v56 }
 0x2b6   :  { %v352_v59 = vrot.slane %v351_v58, 1 }
 0x2b8   :  { %v353_v60 = vadd.f32 %v352_v59, %v351_v58 }
 0x2ba   :  { %v354_v61 = vmul.f32 0.125, %v353_v60 }
 0x2bc   :  { %v355_v62 = vsub.f32 %v342_v53, %v354_v61 }
 0x2be   :  { %v356_v63 = vmul.f32 %v355_v62, %v355_v62 }
 0x2c0   :  { %v357_v0 = vrot.slane %v356_v63, 4 }
 0x2c2   :  { %v358_v1 = vadd.f32 %v357_v0, %v356_v63 }
 0x2c4   :  { %v359_v2 = vrot.slane %v358_v1, 2 }
 0x2c6   :  { %v360_v3 = vadd.f32 %v359_v2, %v358_v1 }
 0x2c8   :  { %v361_v5 = vrot.slane %v360_v3, 1 }
 0x2ca   :  { %v362_v6 = vadd.f32 %v361_v5, %v360_v3 }
 0x2cc   :  { %v363_v7 = vmul.f32 0.125, %v362_v6 }
 0x2ce   :  { %v364_v8 = vadd.f32 1e-05, %v363_v7 }
 0x2d0   :  { %567 = vrsqrt.f32 %v364_v8 }
 0x2da   :  { %v568_v10 = vpop.eup %567 }
 0x2db   :  { %v366_v11 = vmul.f32 %v568_v10, %v346_v9 }
 0x2dd   :  { %v367_v13 = vmul.f32 %v366_v11, %v354_v61  ;;  %v373_v14 = vrot.slane %v366_v11, %v748_v52 }
 0x2df   :  { %v368_v15 = vsub.f32 %v347_v12, %v367_v13  ;;  %v375_v16 = vmul.f32 %v373_v14, %v342_v53 }
 0x2e1   :  { %v380_v17 = vrot.slane %v368_v15, %v748_v52 }
 0x2e3   :  { %v382_v18 = vadd.f32 %v380_v17, %v375_v16 }
 0x2e5   :  { %v383_v19 = vmax.f32 %v382_v18, 0.0 }
 0x2e7   :  { %384 = vst.msk [vmem:[#allocation5] sm:$0xff] %vm96_vm4, %v383_v19  ;;  %391 = vrot.lane.b32.xlu0 %v383_v19, %s629_s17  ;;  %386 = vrot.lane.b32.xlu1 %v383_v19, %s630_s7 }
 0x2eb   :  { %401 = vrot.lane.b32.xlu0 %v383_v19, %s631_s18  ;;  %396 = vrot.lane.b32.xlu1 %v383_v19, %s632_s22 }
 0x2ef   :  { %411 = vrot.lane.b32.xlu0 %v383_v19, %s633_s8  ;;  %406 = vrot.lane.b32.xlu1 %v383_v19, %s634_s23 }
 0x2f3   :  { %416 = vrot.lane.b32.xlu1 %v383_v19, %s625_s21  ;;  %s591_s21 = scalar_lea.vmem %s427_s25, 1024 }
 0x2f4   :  { %p592_p8 = scmp.ne.s32.totalorder %s427_s25, %s591_s21  ;;  %p597_p10 = scmp.lt.s32.totalorder %s591_s21, %s591_s21 }
 0x2f6   :  { %p598_p11 = por %p597_p10, %p596_p9 }
 0x2f8   :  { %p599_p12 = pnand %p598_p11, %p592_p8 }
 0x359   :  { %v392_v20 = vpop.permute.xlu0 %391  ;;  %v387_v52 = vpop.permute.xlu1 %386 }
 0x35a   :  { %395 = vst.msk [vmem:[#allocation5 + $0x10] sm:$0xff] %vm96_vm4, %v392_v20  ;;  %390 = vst.msk [vmem:[#allocation5 + $0x8] sm:$0xff] %vm96_vm4, %v387_v52 }
 0x35d   :  { %v402_v21 = vpop.permute.xlu0 %401  ;;  %v397_v22 = vpop.permute.xlu1 %396 }
 0x35e   :  { %405 = vst.msk [vmem:[#allocation5 + $0x20] sm:$0xff] %vm96_vm4, %v402_v21  ;;  %400 = vst.msk [vmem:[#allocation5 + $0x18] sm:$0xff] %vm96_vm4, %v397_v22 }
 0x361   :  { %v412_v23 = vpop.permute.xlu0 %411  ;;  %v407_v24 = vpop.permute.xlu1 %406 }
 0x362   :  { %415 = vst.msk [vmem:[#allocation5 + $0x30] sm:$0xff] %vm96_vm4, %v412_v23  ;;  %410 = vst.msk [vmem:[#allocation5 + $0x28] sm:$0xff] %vm96_vm4, %v407_v24 }
 0x365   :  { %v417_v25 = vpop.permute.xlu1 %416 }
 0x366   :  { %420 = vst.msk [vmem:[#allocation5 + $0x38] sm:$0xff] %vm96_vm4, %v417_v25 }
 0x367   :  { %602 = shalt.err (!%p599_p12)
}
 0x368   :  { %s603_s27 = scalar_lea.hbm %s812_s9, 1024 }
 0x369   :  { %p604_p13 = scmp.ne.s32.totalorder %s812_s9, %s603_s27  ;;  %p607_p0 = scmp.lt.u32.totalorder %s603_s27, %s812_s9 }
 0x36b   :  { %p609_p1 = pnand %p607_p0, %p604_p13 }
 0x36d   :  { %612 = shalt.err (!%p609_p1)
}
 0x36e   :  { %432 = dma.vmem_to_hbm [thread:$0]  %s427_s25, 1024, %s812_s9, [#allocation4], %s618_s19, %s618_s19, %s619_s20  }
 0x36f   :  { %615 = dma.done.wait [#allocation4], 1024  }
 0x370   :  { %616 = vsyncadd [#allocation4], 4294966272 }
 0x371   :  { %436 = vsyncpa [#allocation3], 1 }
 0x372   :  { %437 = vsyncpa [#allocation4], 1 }

</bundles_post_ra>
